<compile_context>
chip_gen: v7x
topology: tpu7x:2x2x1
jax: 0.10.0
libtpu: 0.0.40
codegen_flags: <defaults>
</compile_context>

<pallas_src>
import jax
import jax.numpy as jnp
from jax.experimental import pallas as pl
from jax.experimental.pallas import tpu as pltpu


def _greedy_kernel(logits_ref, y_ref, idx_ref):
    """logits: [B, N] -> y (one-hot, f32) [B, N], idx (int32) [B, 1]."""
    x = logits_ref[...]                                        # [B, N]
    n = x.shape[1]

    # Row-wise max (XLU reduce along lanes).
    row_max = jnp.max(x, axis=1, keepdims=True)                # [B, 1]

    # First index attaining the max (torch.max tie-break = first occurrence).
    col = jax.lax.broadcasted_iota(jnp.int32, x.shape, 1)      # [B, N]
    masked_cols = jnp.where(x == row_max, col, jnp.int32(n))   # ties -> keep col
    first_idx = jnp.min(masked_cols, axis=1, keepdims=True)    # [B, 1]

    # One-hot at the argmax position.
    y_ref[...] = (col == first_idx).astype(y_ref.dtype)        # [B, N]
    idx_ref[...] = first_idx.astype(idx_ref.dtype)             # [B, 1]


def greedy_connector_forward(logits, return_max_id=False):
    """Pallas implementation of GreedyConnector.forward.

    logits: [batch_size, n_class] float array.
    Returns one-hot [batch_size, n_class] (f32), and optionally the argmax
    indices [batch_size, 1] (int32, keepdim like torch.max(..., keepdim=True)).
    """
    b, n = logits.shape
    y, y_hard = pl.pallas_call(
        _greedy_kernel,
        out_shape=(
            jax.ShapeDtypeStruct((b, n), jnp.float32),
            jax.ShapeDtypeStruct((b, 1), jnp.int32),
        ),
        # Grid-less call: whole arrays live in VMEM, single kernel invocation.
        in_specs=[pl.BlockSpec(memory_space=pltpu.MemorySpace.VMEM)],
        out_specs=(
            pl.BlockSpec(memory_space=pltpu.MemorySpace.VMEM),
            pl.BlockSpec(memory_space=pltpu.MemorySpace.VMEM),
        ),
    )(logits)
    if return_max_id:
        return y, y_hard
    return y


if __name__ == "__main__":
    # Small shapes consistent with the module: logits [batch_size, n_class].
    batch_size = 8
    n_class = 32

    key = jax.random.PRNGKey(0)
    logits = jax.random.normal(key, (batch_size, n_class), jnp.float32)
    # Force a tie in row 0 to exercise the first-occurrence tie-break.
    row0_max = jnp.max(logits[0])
    logits = logits.at[0, 3].set(row0_max).at[0, 17].set(row0_max)

    y, y_hard = greedy_connector_forward(logits, return_max_id=True)
    jax.block_until_ready((y, y_hard))

    # Pure-JAX reference (same semantics as the PyTorch forward).
    ref_idx = jnp.argmax(logits, axis=1).reshape(-1, 1)            # first max
    ref_onehot = (
        jax.lax.broadcasted_iota(jnp.int32, logits.shape, 1) == ref_idx
    ).astype(jnp.float32)

    assert y.shape == (batch_size, n_class)
    assert y_hard.shape == (batch_size, 1)
    assert y.dtype == jnp.float32
    assert jnp.array_equal(y_hard, ref_idx.astype(jnp.int32))
    assert jnp.allclose(y, ref_onehot)
    assert jnp.all(jnp.sum(y, axis=1) == 1.0)        # exactly one 1 per row

    # return_max_id=False path.
    y_only = greedy_connector_forward(logits, return_max_id=False)
    jax.block_until_ready(y_only)
    assert jnp.allclose(y_only, ref_onehot)

    print("KERNEL_OK")
</pallas_src>

<mosaic_0001>
module attributes {stable_mosaic.version = 11 : i64} {
  func.func @_greedy_kernel(%arg0: memref<8x32xf32, #tpu.memory_space<vmem>>, %arg1: memref<8x32xf32, #tpu.memory_space<vmem>>, %arg2: memref<8x1xi32, #tpu.memory_space<vmem>>) attributes {dimension_semantics = [], scalar_prefetch = 0 : i64, scratch_operands = 0 : i64, tpu.core_type = #tpu.core_type<tc>} {
    %c0 = arith.constant 0 : index
    %c0_0 = arith.constant 0 : index
    %0 = vector.load %arg0[%c0, %c0_0] : memref<8x32xf32, #tpu.memory_space<vmem>>, vector<8x32xf32>
    %cst = arith.constant dense<0xFF800000> : vector<8xf32>
    %1 = vector.multi_reduction <maximumf>, %0, %cst [1] : vector<8x32xf32> to vector<8xf32>
    %2 = vector.shape_cast %1 : vector<8xf32> to vector<8x1xf32>
    %3 = tpu.iota {dimensions = array<i32: 1>} : vector<8x32xi32>
    %4 = vector.broadcast %2 : vector<8x1xf32> to vector<8x32xf32>
    %5 = arith.cmpf oeq, %0, %4 : vector<8x32xf32>
    %c32_i32 = arith.constant 32 : i32
    %6 = vector.broadcast %c32_i32 : i32 to vector<8x32xi32>
    %7 = arith.select %5, %3, %6 : vector<8x32xi1>, vector<8x32xi32>
    %cst_1 = arith.constant dense<2147483647> : vector<8xi32>
    %8 = vector.multi_reduction <minsi>, %7, %cst_1 [1] : vector<8x32xi32> to vector<8xi32>
    %9 = vector.shape_cast %8 : vector<8xi32> to vector<8x1xi32>
    %10 = vector.broadcast %9 : vector<8x1xi32> to vector<8x32xi32>
    %11 = arith.cmpi eq, %3, %10 : vector<8x32xi32>
    %12 = arith.extui %11 : vector<8x32xi1> to vector<8x32xi32>
    %13 = arith.sitofp %12 : vector<8x32xi32> to vector<8x32xf32>
    %c0_2 = arith.constant 0 : index
    %c0_3 = arith.constant 0 : index
    %14 = vector.load %arg1[%c0_2, %c0_3] : memref<8x32xf32, #tpu.memory_space<vmem>>, vector<8x32xf32>
    tpu.vector_store %arg1[%c0_2, %c0_3], %13 {strides = array<i32>} : memref<8x32xf32, #tpu.memory_space<vmem>>, vector<8x32xf32>,
    %c0_4 = arith.constant 0 : index
    %c0_5 = arith.constant 0 : index
    %15 = vector.load %arg2[%c0_4, %c0_5] : memref<8x1xi32, #tpu.memory_space<vmem>>, vector<8x1xi32>
    tpu.vector_store %arg2[%c0_4, %c0_5], %9 {strides = array<i32>} : memref<8x1xi32, #tpu.memory_space<vmem>>, vector<8x1xi32>,
    return
  }
}

</mosaic_0001>

<bundles_post_ra>
// kernel: tpu_custom_call.1
= control target key start
LH: loop header
LB: loop body
LE: loop exit
PB: predicated region body
PF: predicated region fallthrough
CT: control target
= control target key end

     0   :  { %8 = vsyncpa [#allocation3], 0  ;;  %s172_s0 = inlined_call_operand.hbm [shape: f32[8,32], index: 0, kind: input, shape index: {}]   ;;  %s173_s1 = inlined_call_operand.hbm [shape: f32[8,32], index: 1, kind: output, shape index: {0}]   ;;  %s174_s2 = inlined_call_operand.vmem [shape: s32[8,1], index: 2, kind: output, shape index: {1}]  }
   0x1   :  { %9 = vsyncpa [#allocation4], 0  ;;  %s124_s9 = smov [#allocation2]   ;;  %s76_s13 = scalar_lea.hbm %s172_s0, 128 }
   0x2   :  { %s16_s10 = sshll.u32 %s124_s9, 4  ;;  %p77_p0 = scmp.ne.s32.totalorder %s172_s0, %s76_s13  ;;  %s17_s10 = int_to_ptr.vmem [resolvable:$true] %s16_s10 }
   0x3   :  { %p80_p1 = scmp.lt.u32.totalorder %s76_s13, %s172_s0 }
   0x5   :  { %p82_p2 = pnand %p80_p1, %p77_p0 }
   0x7   :  { %85 = shalt.err (!%p82_p2)
}
   0x8   :  { %s86_s18 = scalar_lea.vmem %s17_s10, 128  ;;  %p91_p4 = scmp.lt.s32.totalorder %s17_s10, %s17_s10 }
   0x9   :  { %p87_p3 = scmp.ne.s32.totalorder %s17_s10, %s86_s18  ;;  %p92_p5 = scmp.lt.s32.totalorder %s86_s18, %s86_s18 }
   0xb   :  { %p93_p6 = por %p92_p5, %p91_p4 }
   0xd   :  { %p94_p7 = pnand %p93_p6, %p87_p3 }
   0xf   :  { %97 = shalt.err (!%p94_p7)
}
  0x10   :  { %19 = dma.hbm_to_vmem [thread:$0]  %s172_s0, 128, %s17_s10, [#allocation3]  }
  0x11   :  { %120 = dma.done.wait [#allocation3], 128  }
  0x12   :  { %121 = vsyncadd [#allocation3], 4294967168  ;;  %vm24_vm0 = vcmask 261120   ;;  %v23_v0 = vld [vmem:[#allocation2] sm:$0xff]  ;;  %v28_v2 = vlaneseq  ;;  %vm51_vm3 = vcmask 7168   ;;  %s125_s0 = smov [#allocation5]  }
  0x13   :  { %v25_v1 = vsel %vm24_vm0, %v23_v0, -inf  ;;  %s59_s21 = sshll.u32 %s125_s0, 4  ;;  %v126_v18 = vmov 0.0   ;;  %s60_s21 = int_to_ptr.vmem [resolvable:$true] %s59_s21 }
  0x14   :  { %26 = vmax.xlane.f32.xlu0 %v25_v1  ;;  %v29_v3 = vand.u32 127, %v28_v2  ;;  %s98_s24 = scalar_lea.vmem %s60_s21, 128  ;;  %p103_p9 = scmp.lt.s32.totalorder %s60_s21, %s60_s21 }
  0x15   :  { %p99_p8 = scmp.ne.s32.totalorder %s60_s21, %s98_s24  ;;  %p104_p10 = scmp.lt.s32.totalorder %s98_s24, %s98_s24 }
  0x17   :  { %p105_p11 = por %p104_p10, %p103_p9 }
  0x19   :  { %p106_p12 = pnand %p105_p11, %p99_p8 }
  0xa1   :  { %v27_v4 = vpop.xlane.xlu0 %26 }
  0xa2   :  { %vm30_vm1 = vcmp.eq.f32.partialorder %v23_v0, %v27_v4 }
  0xa3   :  { %v31_v5 = vsel %vm30_vm1, %v29_v3, 32 }
  0xa4   :  { %v32_v6 = vsel %vm24_vm0, %v31_v5, 2147483647 }
  0xa5   :  { %v34_v7 = vshra.s32 %v32_v6, 16  ;;  %v33_v9 = vand.u32 65535, %v32_v6 }
  0xa7   :  { %v36_v8 = vcvt.s32.f32 %v34_v7  ;;  %v35_v11 = vcvt.s32.f32 %v33_v9 }
  0xa9   :  { %37 = vmin.xlane.f32.xlu0 %v36_v8 }
 0x136   :  { %v38_v10 = vpop.xlane.xlu0 %37 }
 0x137   :  { %vm39_vm2 = vcmp.eq.f32.partialorder %v36_v8, %v38_v10  ;;  %v44_v13 = vcvt.f32.s32 %v38_v10 }
 0x138   :  { %v40_v12 = vsel %vm39_vm2, %v35_v11, inf }
 0x139   :  { %41 = vmin.xlane.f32.xlu1 %v40_v12  ;;  %v45_v15 = vshll.u32 %v44_v13, 16 }
 0x1c6   :  { %v42_v14 = vpop.xlane.xlu1 %41 }
 0x1c7   :  { %v43_v16 = vcvt.f32.s32 %v42_v14 }
 0x1c9   :  { %v46_v17 = vadd.s32 %v45_v15, %v43_v16 }
 0x1cb   :  { %vm47_vm4 = vcmp.eq.s32.totalorder %v29_v3, %v46_v17  ;;  %52 = vst.msk [vmem:[%s174_s2] sm:$0xff] %vm51_vm3, %v46_v17 }
 0x1cc   :  { %v72_v19 = vsel %vm47_vm4, 1.0, %v126_v18 }
 0x1cd   :  { %50 = vst.msk [vmem:[#allocation5] sm:$0xff] %vm24_vm0, %v72_v19 }
 0x1ce   :  { %109 = shalt.err (!%p106_p12)
}
 0x1cf   :  { %s110_s27 = scalar_lea.hbm %s173_s1, 128 }
 0x1d0   :  { %p111_p13 = scmp.ne.s32.totalorder %s173_s1, %s110_s27  ;;  %p114_p0 = scmp.lt.u32.totalorder %s110_s27, %s173_s1 }
 0x1d2   :  { %p116_p1 = pnand %p114_p0, %p111_p13 }
 0x1d4   :  { %119 = shalt.err (!%p116_p1)
}
 0x1d5   :  { %62 = dma.vmem_to_hbm [thread:$0]  %s60_s21, 128, %s173_s1, [#allocation4]  }
 0x1d6   :  { %122 = dma.done.wait [#allocation4], 128  }
 0x1d7   :  { %123 = vsyncadd [#allocation4], 4294967168 }
 0x1d8   :  { %70 = vsyncpa [#allocation3], 1 }
 0x1d9   :  { %71 = vsyncpa [#allocation4], 1 }

</bundles_post_ra>
